<compile_context>
chip_gen: v6e
topology: v6e:2x2x1
jax: 0.10.0
libtpu: 0.0.40
codegen_flags: <defaults>
</compile_context>

<pallas_src>
import jax
import jax.numpy as jnp
from jax.experimental import pallas as pl
from jax.experimental.pallas import tpu as pltpu


def _round_down(x, m):
    return (x // m) * m


# ---------------------------------------------------------------------------
# Kernels
# ---------------------------------------------------------------------------

def _qkv_resident_kernel(x_ref, w_ref, b_ref, o_ref):
    """Whole fused weight resident in VMEM.

    x_ref : (tile_m, D)   w_ref : (3, D, D)   b_ref : (3, 1, D)
    o_ref : (3, tile_m, D)
    """
    x = x_ref[...]
    for p in range(3):                       # static -> unrolled (3 MXU streams)
        acc = jnp.dot(x, w_ref[p], preferred_element_type=jnp.float32)
        acc = acc + b_ref[p].astype(jnp.float32)
        o_ref[p] = acc.astype(o_ref.dtype)


def _qkv_tiled_kernel(x_ref, w_ref, b_ref, o_ref):
    """One (tile_m, D) x (D, tile_n) MXU matmul + f32 bias add.

    x_ref : (tile_m, D)   w_ref : (D, tile_n)   b_ref : (1, tile_n)
    o_ref : (tile_m, tile_n)
    """
    acc = jnp.dot(x_ref[...], w_ref[...], preferred_element_type=jnp.float32)
    acc = acc + b_ref[...].astype(jnp.float32)
    o_ref[...] = acc.astype(o_ref.dtype)


# ---------------------------------------------------------------------------
# Parameter preparation (ONCE, off the hot path)
# ---------------------------------------------------------------------------

def prepare_qkv_params(wq, bq, wk, bk, wv, bv, *, dtype=jnp.bfloat16):
    """Fuse PyTorch-style (out, in) weights into a (3, D, D) (in, out) operand
    plus a (3, 1, D) float32 bias.

    Call ONCE at parameter-setup time.  dtype=jnp.bfloat16 (default) halves
    weight HBM/VMEM traffic and uses the full-rate bf16 MXU path; in-kernel
    accumulation stays float32.  Pass dtype=jnp.float32 (or None to keep the
    input dtype) for exact nn.Linear-in-f32 semantics.
    """
    w_fused = jnp.stack([wq.T, wk.T, wv.T], axis=0)                 # (3, D, D)
    b_fused = jnp.stack([bq, bk, bv], axis=0).reshape(3, 1, -1).astype(jnp.float32)
    if dtype is not None:
        w_fused = w_fused.astype(dtype)
    return w_fused, b_fused


# ---------------------------------------------------------------------------
# Tile planning
# ---------------------------------------------------------------------------

def _vmem_capacity_bytes():
    try:
        return int(pltpu.get_tpu_info().vmem_capacity_bytes)
    except Exception:
        return 64 * 1024 * 1024     # conservative (v7x per-TC VMEM)


def _plan(M, D, x_itm, w_itm, o_itm, budget, tile_m_req, tile_n_req):
    """Pick (resident, tile_m, tile_n) against the per-core VMEM budget."""
    pack = {4: 8, 2: 16, 1: 32}.get(x_itm, 8)      # sublane packing per dtype
    w_total = 3 * D * D * w_itm

    resident = tile_n_req is None and 2 * w_total <= int(0.6 * budget)
    if resident:
        tile_n = D
        fixed = 2 * w_total + 3 * D * 4                       # weight (2 bufs) + bias
        per_row = 2 * D * x_itm + 2 * 3 * D * o_itm + D * 4   # x, out (2 bufs), f32 acc
    else:
        if tile_n_req is not None:
            tile_n = int(tile_n_req)
            if tile_n != D and (D % tile_n != 0 or tile_n % 128 != 0):
                raise ValueError(
                    f"tile_n={tile_n} must divide D={D} and be a multiple of 128 "
                    f"(or equal D)")
        else:
            tile_n = D
            for cand in (512, 256, 128):     # prefer 256-aligned (256-wide MXU)
                if D % cand == 0:
                    tile_n = cand
                    break
        fixed = 2 * D * tile_n * w_itm + tile_n * 4
        per_row = 2 * D * x_itm + 2 * tile_n * o_itm + tile_n * 4

    cap = max(pack, (budget - fixed) // per_row)

    if tile_m_req is not None:
        tile_m = min(int(tile_m_req), M)
        if tile_m != M and tile_m % 8 != 0:
            raise ValueError(f"tile_m={tile_m_req} must be a multiple of 8 (or >= M)")
    else:
        tile_m = min(1024, cap)
        if M <= tile_m:
            tile_m = M                      # full extent is always a legal block dim
        else:
            tile_m = max(pack, _round_down(tile_m, pack))
    return resident, int(tile_m), int(tile_n)


# ---------------------------------------------------------------------------
# Forward
# ---------------------------------------------------------------------------

def multi_projection_fused(x, w_fused, b_fused, *, tile_m=None, tile_n=None):
    """
    x       : (B, S, D)
    w_fused : (3, D, D)   from prepare_qkv_params (laid out (in, out))
    b_fused : (3, 1, D)   float32
    returns (q, k, v), each (B, S, D) in x.dtype.
    """
    B, S, D = x.shape
    assert w_fused.shape == (3, D, D), w_fused.shape
    assert b_fused.shape == (3, 1, D), b_fused.shape

    out_dtype = x.dtype
    compute_dtype = w_fused.dtype
    M = B * S
    x2 = x.reshape(M, D)
    if x2.dtype != compute_dtype:
        x2 = x2.astype(compute_dtype)       # activations follow the weight dtype

    x_itm = jnp.dtype(compute_dtype).itemsize
    w_itm = jnp.dtype(w_fused.dtype).itemsize
    o_itm = jnp.dtype(out_dtype).itemsize

    capacity = _vmem_capacity_bytes()
    budget = int(capacity * 0.70)           # planning budget (compiler headroom)
    vmem_limit = int(capacity * 0.90)

    resident, tm, tn = _plan(M, D, x_itm, w_itm, o_itm, budget, tile_m, tile_n)
    num_m = pl.cdiv(M, tm)                  # partial last block handled by Pallas

    if resident:
        grid = (num_m,)
        in_specs = [
            pl.BlockSpec((tm, D), lambda i: (i, 0)),
            pl.BlockSpec((3, D, D), lambda i: (0, 0, 0)),   # constant -> DMA'd once
            pl.BlockSpec((3, 1, D), lambda i: (0, 0, 0)),
        ]
        out_spec = pl.BlockSpec((3, tm, D), lambda i: (0, i, 0))
        kernel = _qkv_resident_kernel
        semantics = ("parallel",)
        w_bytes = 3 * D * D * w_itm
    else:
        num_d = D // tn
        grid = (num_m, 3, num_d)
        in_specs = [
            pl.BlockSpec((tm, D), lambda i, p, d: (i, 0)),
            pl.BlockSpec((None, D, tn), lambda i, p, d: (p, 0, d)),
            pl.BlockSpec((None, 1, tn), lambda i, p, d: (p, 0, d)),
        ]
        out_spec = pl.BlockSpec((None, tm, tn), lambda i, p, d: (p, i, d))
        kernel = _qkv_tiled_kernel
        semantics = ("parallel", "parallel", "parallel")
        w_bytes = num_m * 3 * D * D * w_itm          # weight re-streamed per M tile

    cost = pl.CostEstimate(
        flops=2 * M * D * 3 * D,
        transcendentals=0,
        bytes_accessed=M * D * x_itm + w_bytes + 3 * D * 4 + 3 * M * D * o_itm,
    )

    qkv = pl.pallas_call(
        kernel,
        out_shape=jax.ShapeDtypeStruct((3, M, D), out_dtype),
        grid_spec=pltpu.PrefetchScalarGridSpec(
            num_scalar_prefetch=0,
            grid=grid,
            in_specs=in_specs,
            out_specs=out_spec,
        ),
        compiler_params=pltpu.CompilerParams(
            dimension_semantics=semantics,
            vmem_limit_bytes=vmem_limit,
        ),
        cost_estimate=cost,
    )(x2, w_fused, b_fused)

    # Leading-axis splits + reshapes are contiguous (no strided output passes).
    q = qkv[0].reshape(B, S, D)
    k = qkv[1].reshape(B, S, D)
    v = qkv[2].reshape(B, S, D)
    return q, k, v


def multi_projection(x, wq, bq, wk, bk, wv, bv, *, dtype=jnp.bfloat16,
                     tile_m=None, tile_n=None):
    """Convenience wrapper matching the PyTorch module signature.

    Prefer calling prepare_qkv_params ONCE and multi_projection_fused per step.
    """
    w_fused, b_fused = prepare_qkv_params(wq, bq, wk, bk, wv, bv, dtype=dtype)
    return multi_projection_fused(x, w_fused, b_fused, tile_m=tile_m, tile_n=tile_n)


def _init_linear_params(key, hidden, dtype=jnp.float32):
    """Deterministic nn.Linear-style init: U(-1/sqrt(in), 1/sqrt(in))."""
    kw, kb = jax.random.split(key)
    bound = 1.0 / (hidden ** 0.5)
    w = jax.random.uniform(kw, (hidden, hidden), dtype, -bound, bound)   # (out, in)
    b = jax.random.uniform(kb, (hidden,), dtype, -bound, bound)
    return w, b


if __name__ == "__main__":
    B, S, D = 2, 8, 32   # small demo; real configs should keep D % 128 == 0

    key = jax.random.PRNGKey(0)
    kx, kq, kk, kv = jax.random.split(key, 4)

    x = jax.random.normal(kx, (B, S, D), jnp.float32)
    wq, bq = _init_linear_params(kq, D)
    wk, bk = _init_linear_params(kk, D)
    wv, bv = _init_linear_params(kv, D)

    # Reference (same semantics as torch nn.Linear, f32).
    q_ref = x @ wq.T + bq
    k_ref = x @ wk.T + bk
    v_ref = x @ wv.T + bv

    # --- f32 compute path: exact semantics, tight tolerance.
    wf32, bf32 = prepare_qkv_params(wq, bq, wk, bk, wv, bv, dtype=jnp.float32)
    q, k, v = multi_projection_fused(x, wf32, bf32)
    jax.block_until_ready((q, k, v))
    assert jnp.allclose(q, q_ref, atol=1e-5, rtol=1e-5)
    assert jnp.allclose(k, k_ref, atol=1e-5, rtol=1e-5)
    assert jnp.allclose(v, v_ref, atol=1e-5, rtol=1e-5)

    # --- default bf16 fast path (f32 accumulation): loose tolerance.
    wbf, bbf = prepare_qkv_params(wq, bq, wk, bk, wv, bv)       # bf16 default
    q2, k2, v2 = multi_projection_fused(x, wbf, bbf)
    jax.block_until_ready((q2, k2, v2))
    assert jnp.allclose(q2, q_ref, atol=5e-2, rtol=5e-2)
    assert jnp.allclose(k2, k_ref, atol=5e-2, rtol=5e-2)
    assert jnp.allclose(v2, v_ref, atol=5e-2, rtol=5e-2)

    print("KERNEL_OK")
</pallas_src>

<mosaic_0001>
module attributes {stable_mosaic.version = 11 : i64} {
  func.func @_qkv_resident_kernel(%arg0: i32, %arg1: memref<16x32xf32, #tpu.memory_space<vmem>>, %arg2: memref<3x32x32xf32, #tpu.memory_space<vmem>>, %arg3: memref<3x1x32xf32, #tpu.memory_space<vmem>>, %arg4: memref<3x16x32xf32, #tpu.memory_space<vmem>>) attributes {dimension_semantics = [#tpu.dimension_semantics<parallel>], iteration_bounds = array<i64: 1>, scalar_prefetch = 0 : i64, scratch_operands = 0 : i64, tpu.core_type = #tpu.core_type<tc>, window_params = [{transform_indices = @transform_0, window_bounds = array<i64: 16, 32>}, {pipeline_mode = #tpu.pipeline_mode<synchronous>, transform_indices = @transform_1, window_bounds = array<i64: 3, 32, 32>}, {pipeline_mode = #tpu.pipeline_mode<synchronous>, transform_indices = @transform_2, window_bounds = array<i64: 3, 1, 32>}, {transform_indices = @transform_3, window_bounds = array<i64: 3, 16, 32>}]} {
    %c0 = arith.constant 0 : index
    %c0_0 = arith.constant 0 : index
    %0 = vector.load %arg1[%c0, %c0_0] : memref<16x32xf32, #tpu.memory_space<vmem>>, vector<16x32xf32>
    %c0_1 = arith.constant 0 : index
    %c0_2 = arith.constant 0 : index
    %c0_3 = arith.constant 0 : index
    %1 = vector.load %arg2[%c0_1, %c0_2, %c0_3] : memref<3x32x32xf32, #tpu.memory_space<vmem>>, vector<1x32x32xf32>
    %2 = vector.shape_cast %1 : vector<1x32x32xf32> to vector<32x32xf32>
    %cst = arith.constant dense<0.000000e+00> : vector<16x32xf32>
    %3 = tpu.matmul %0, %2, %cst {dimension_numbers = #tpu.dot_dimension_numbers<[1], [0], [0], [1], [0, 0, 1, 1], [], []>} : vector<16x32xf32>, vector<32x32xf32>, vector<16x32xf32> -> vector<16x32xf32>
    %c0_4 = arith.constant 0 : index
    %c0_5 = arith.constant 0 : index
    %c0_6 = arith.constant 0 : index
    %4 = vector.load %arg3[%c0_4, %c0_5, %c0_6] : memref<3x1x32xf32, #tpu.memory_space<vmem>>, vector<1x1x32xf32>
    %5 = vector.shape_cast %4 : vector<1x1x32xf32> to vector<1x32xf32>
    %6 = vector.broadcast %5 : vector<1x32xf32> to vector<16x32xf32>
    %7 = arith.addf %3, %6 : vector<16x32xf32>
    %c0_7 = arith.constant 0 : index
    %c0_8 = arith.constant 0 : index
    %c0_9 = arith.constant 0 : index
    %8 = vector.load %arg4[%c0_7, %c0_8, %c0_9] : memref<3x16x32xf32, #tpu.memory_space<vmem>>, vector<1x16x32xf32>
    %9 = vector.shape_cast %8 : vector<1x16x32xf32> to vector<16x32xf32>
    %10 = vector.shape_cast %7 : vector<16x32xf32> to vector<1x16x32xf32>
    tpu.vector_store %arg4[%c0_7, %c0_8, %c0_9], %10 {strides = array<i32>} : memref<3x16x32xf32, #tpu.memory_space<vmem>>, vector<1x16x32xf32>,
    %c1 = arith.constant 1 : index
    %c0_10 = arith.constant 0 : index
    %c0_11 = arith.constant 0 : index
    %11 = vector.load %arg2[%c1, %c0_10, %c0_11] : memref<3x32x32xf32, #tpu.memory_space<vmem>>, vector<1x32x32xf32>
    %12 = vector.shape_cast %11 : vector<1x32x32xf32> to vector<32x32xf32>
    %cst_12 = arith.constant dense<0.000000e+00> : vector<16x32xf32>
    %13 = tpu.matmul %0, %12, %cst_12 {dimension_numbers = #tpu.dot_dimension_numbers<[1], [0], [0], [1], [0, 0, 1, 1], [], []>} : vector<16x32xf32>, vector<32x32xf32>, vector<16x32xf32> -> vector<16x32xf32>
    %c1_13 = arith.constant 1 : index
    %c0_14 = arith.constant 0 : index
    %c0_15 = arith.constant 0 : index
    %14 = vector.load %arg3[%c1_13, %c0_14, %c0_15] : memref<3x1x32xf32, #tpu.memory_space<vmem>>, vector<1x1x32xf32>
    %15 = vector.shape_cast %14 : vector<1x1x32xf32> to vector<1x32xf32>
    %16 = vector.broadcast %15 : vector<1x32xf32> to vector<16x32xf32>
    %17 = arith.addf %13, %16 : vector<16x32xf32>
    %c1_16 = arith.constant 1 : index
    %c0_17 = arith.constant 0 : index
    %c0_18 = arith.constant 0 : index
    %18 = vector.load %arg4[%c1_16, %c0_17, %c0_18] : memref<3x16x32xf32, #tpu.memory_space<vmem>>, vector<1x16x32xf32>
    %19 = vector.shape_cast %18 : vector<1x16x32xf32> to vector<16x32xf32>
    %20 = vector.shape_cast %17 : vector<16x32xf32> to vector<1x16x32xf32>
    tpu.vector_store %arg4[%c1_16, %c0_17, %c0_18], %20 {strides = array<i32>} : memref<3x16x32xf32, #tpu.memory_space<vmem>>, vector<1x16x32xf32>,
    %c2 = arith.constant 2 : index
    %c0_19 = arith.constant 0 : index
    %c0_20 = arith.constant 0 : index
    %21 = vector.load %arg2[%c2, %c0_19, %c0_20] : memref<3x32x32xf32, #tpu.memory_space<vmem>>, vector<1x32x32xf32>
    %22 = vector.shape_cast %21 : vector<1x32x32xf32> to vector<32x32xf32>
    %cst_21 = arith.constant dense<0.000000e+00> : vector<16x32xf32>
    %23 = tpu.matmul %0, %22, %cst_21 {dimension_numbers = #tpu.dot_dimension_numbers<[1], [0], [0], [1], [0, 0, 1, 1], [], []>} : vector<16x32xf32>, vector<32x32xf32>, vector<16x32xf32> -> vector<16x32xf32>
    %c2_22 = arith.constant 2 : index
    %c0_23 = arith.constant 0 : index
    %c0_24 = arith.constant 0 : index
    %24 = vector.load %arg3[%c2_22, %c0_23, %c0_24] : memref<3x1x32xf32, #tpu.memory_space<vmem>>, vector<1x1x32xf32>
    %25 = vector.shape_cast %24 : vector<1x1x32xf32> to vector<1x32xf32>
    %26 = vector.broadcast %25 : vector<1x32xf32> to vector<16x32xf32>
    %27 = arith.addf %23, %26 : vector<16x32xf32>
    %c2_25 = arith.constant 2 : index
    %c0_26 = arith.constant 0 : index
    %c0_27 = arith.constant 0 : index
    %28 = vector.load %arg4[%c2_25, %c0_26, %c0_27] : memref<3x16x32xf32, #tpu.memory_space<vmem>>, vector<1x16x32xf32>
    %29 = vector.shape_cast %28 : vector<1x16x32xf32> to vector<16x32xf32>
    %30 = vector.shape_cast %27 : vector<16x32xf32> to vector<1x16x32xf32>
    tpu.vector_store %arg4[%c2_25, %c0_26, %c0_27], %30 {strides = array<i32>} : memref<3x16x32xf32, #tpu.memory_space<vmem>>, vector<1x16x32xf32>,
    return
  }
  func.func @transform_0(%arg0: i32) -> (i32, i32) {
    %c0_i32 = arith.constant 0 : i32
    %c0_i32_0 = arith.constant 0 : i32
    return %arg0, %c0_i32 : i32, i32
  }
  func.func @transform_1(%arg0: i32) -> (i32, i32, i32) {
    %c0_i32 = arith.constant 0 : i32
    %c0_i32_0 = arith.constant 0 : i32
    %c0_i32_1 = arith.constant 0 : i32
    %c0_i32_2 = arith.constant 0 : i32
    return %c0_i32, %c0_i32_0, %c0_i32_1 : i32, i32, i32
  }
  func.func @transform_2(%arg0: i32) -> (i32, i32, i32) {
    %c0_i32 = arith.constant 0 : i32
    %c0_i32_0 = arith.constant 0 : i32
    %c0_i32_1 = arith.constant 0 : i32
    %c0_i32_2 = arith.constant 0 : i32
    return %c0_i32, %c0_i32_0, %c0_i32_1 : i32, i32, i32
  }
  func.func @transform_3(%arg0: i32) -> (i32, i32, i32) {
    %c0_i32 = arith.constant 0 : i32
    %c0_i32_0 = arith.constant 0 : i32
    %c0_i32_1 = arith.constant 0 : i32
    return %c0_i32, %arg0, %c0_i32_0 : i32, i32, i32
  }
}

</mosaic_0001>

<bundles_post_ra>
// kernel: tpu_custom_call.1
= control target key start
LH: loop header
LB: loop body
LE: loop exit
PB: predicated region body
PF: predicated region fallthrough
CT: control target
= control target key end

     0   :  { %8 = vsyncpa [#allocation3], 0  ;;  %s537_s0 = inlined_call_operand.hbm [shape: f32[16,32], index: 0, kind: input, shape index: {}]   ;;  %s538_s1 = inlined_call_operand.hbm [shape: f32[3,32,32], index: 1, kind: input, shape index: {}]   ;;  %s539_s2 = inlined_call_operand.vmem [shape: f32[3,1,32], index: 2, kind: input, shape index: {}]   ;;  %s540_s3 = inlined_call_operand.hbm [shape: f32[3,16,32], index: 3, kind: output, shape index: {}]  }
   0x1   :  { %9 = vsyncpa [#allocation6], 0 }
   0x2   :  { %10 = vsyncpa [#allocation4], 0  ;;  %s473_s12 = smov [#allocation2]  }
   0x3   :  { %s16_s13 = sshll.u32 %s473_s12, 4  ;;  %s17_s13 = int_to_ptr.vmem [resolvable:$true] %s16_s13 }
   0x4   :  { %s415_s14 = scalar_lea.vmem %s17_s13, 256  ;;  %p420_p1 = scmp.lt.s32.totalorder %s17_s13, %s17_s13 }
   0x5   :  { %p416_p0 = scmp.ne.s32.totalorder %s17_s13, %s415_s14  ;;  %p421_p2 = scmp.lt.s32.totalorder %s415_s14, %s415_s14 }
   0x7   :  { %p422_p3 = por %p421_p2, %p420_p1 }
   0x9   :  { %p423_p4 = pnand %p422_p3, %p416_p0 }
   0xb   :  { %426 = shalt.err (!%p423_p4)
}
   0xc   :  { %s474_s15 = smov 128   ;;  %s475_s16 = smov 8  }
   0xd   :  { %22 = dma.hbm_to_vmem [thread:$0]  %s537_s0, 256, %s17_s13, [#allocation3], %s474_s15, %s474_s15, %s475_s16  }
   0xe   :  { %s476_s19 = smov [#allocation5]  }
   0xf   :  { %s28_s20 = sshll.u32 %s476_s19, 4  ;;  %s29_s20 = int_to_ptr.vmem [resolvable:$true] %s28_s20 }
  0x10   :  { %s435_s21 = scalar_lea.vmem %s29_s20, 1536  ;;  %p440_p6 = scmp.lt.s32.totalorder %s29_s20, %s29_s20 }
  0x11   :  { %p436_p5 = scmp.ne.s32.totalorder %s29_s20, %s435_s21  ;;  %p441_p7 = scmp.lt.s32.totalorder %s435_s21, %s435_s21 }
  0x13   :  { %p442_p8 = por %p441_p7, %p440_p6 }
  0x15   :  { %p443_p9 = pnand %p442_p8, %p436_p5 }
  0x17   :  { %446 = shalt.err (!%p443_p9)
}
  0x18   :  { %34 = dma.hbm_to_vmem [thread:$0]  %s538_s1, 1536, %s29_s20, [#allocation6], %s474_s15, %s474_s15, %s475_s16  }
  0x19   :  { %467 = dma.done.wait [#allocation3], 256  }
  0x1a   :  { %468 = vsyncadd [#allocation3], 4294967040 }
  0x1b   :  { %469 = dma.done.wait [#allocation6], 1536  }
  0x1c   :  { %470 = vsyncadd [#allocation6], 4294965760  ;;  %v48_v0 = vld [vmem:[#allocation5 + $0x18] sm:$0xff]  ;;  %v47_v1 = vld [vmem:[#allocation5 + $0x10] sm:$0xff]  ;;  %vm56_vm0 = vcmask 261120   ;;  %s477_s28 = smov [#allocation7]  }
  0x1d   :  { %369 = vmatprep.subr.mxu0 %v48_v0  ;;  %v144_v2 = vld [vmem:[#allocation5 + $0x38] sm:$0xff]  ;;  %v43_v3 = vld [vmem:[#allocation2] sm:$0xff]  ;;  %v46_v4 = vld [vmem:[#allocation5 + $0x8] sm:$0xff]  ;;  %s327_s29 = sshll.u32 %s477_s28, 4  ;;  %s328_s29 = int_to_ptr.vmem [resolvable:$true] %s327_s29 }
  0x1e   :  { %370 = vmatpush3.msra.mxu0 %v48_v0  ;;  %380 = vmatprep.subr.mxu1 %v144_v2  ;;  %v143_v5 = vld [vmem:[#allocation5 + $0x30] sm:$0xff]  ;;  %v45_v6 = vld [vmem:[#allocation5] sm:$0xff]  ;;  %v142_v7 = vld [vmem:[#allocation5 + $0x28] sm:$0xff]  ;;  %s447_s30 = scalar_lea.vmem %s328_s29, 768  ;;  %p452_p11 = scmp.lt.s32.totalorder %s328_s29, %s328_s29 }
  0x1f   :  { %371 = vmatprep.subr.mxu0 %v47_v1  ;;  %377 = vmatprep.mubr.msk.f32.mxu0 %vm56_vm0, %v43_v3  ;;  %v44_v8 = vld [vmem:[#allocation2 + $0x8] sm:$0xff]  ;;  %v141_v10 = vld [vmem:[#allocation5 + $0x20] sm:$0xff]  ;;  %v234_v11 = vld [vmem:[#allocation5 + $0x50] sm:$0xff]  ;;  %p448_p10 = scmp.ne.s32.totalorder %s328_s29, %s447_s30  ;;  %p453_p12 = scmp.lt.s32.totalorder %s447_s30, %s447_s30 }
  0x20   :  { %372 = vmatpush3.msra.mxu0 %v47_v1  ;;  %381 = vmatpush3.msra.mxu1 %v144_v2  ;;  %v235_v9 = vld [vmem:[#allocation5 + $0x58] sm:$0xff]  ;;  %v233_v12 = vld [vmem:[#allocation5 + $0x48] sm:$0xff]  ;;  %v232_v13 = vld [vmem:[#allocation5 + $0x40] sm:$0xff] }
  0x21   :  { %373 = vmatprep.subr.mxu0 %v46_v4  ;;  %382 = vmatprep.subr.mxu1 %v143_v5  ;;  %v340_v14 = vld [vmem:[%s539_s2] ss:$0 sm:$0xff]  ;;  %v344_v18 = vld [vmem:[%s539_s2 + $0x1] ss:$0 sm:$0xff]  ;;  %v348_v23 = vld [vmem:[%s539_s2 + $0x2] ss:$0 sm:$0xff]  ;;  %p454_p13 = por %p453_p12, %p452_p11 }
  0x22   :  { %374 = vmatpush3.msra.mxu0 %v46_v4  ;;  %383 = vmatpush3.msra.mxu1 %v143_v5 }
  0x23   :  { %375 = vmatprep.subr.mxu0 %v45_v6  ;;  %384 = vmatprep.subr.mxu1 %v142_v7  ;;  %p455_p0 = pnand %p454_p13, %p448_p10 }
  0x24   :  { %376 = vmatpush3.msra.mxu0 %v45_v6  ;;  %385 = vmatpush3.msra.mxu1 %v142_v7 }
  0x25   :  { %378 = vmatmul.mubr.msk.f32.vlgmr.msra.gmra.mxu0 %vm56_vm0, %v44_v8  ;;  %391 = vmatprep.subr.mxu0 %v235_v9 }
  0x26   :  { %392 = vmatpush3.msra.mxu0 %v235_v9  ;;  %386 = vmatprep.subr.mxu1 %v141_v10 }
  0x27   :  { %393 = vmatprep.subr.mxu0 %v234_v11  ;;  %387 = vmatpush3.msra.mxu1 %v141_v10 }
  0x28   :  { %394 = vmatpush3.msra.mxu0 %v234_v11  ;;  %388 = vmatprep.mubr.msk.f32.mxu1 %vm56_vm0, %v43_v3 }
  0x29   :  { %395 = vmatprep.subr.mxu0 %v233_v12  ;;  %389 = vmatmul.mubr.msk.f32.vlgmr.msra.gmra.mxu1 %vm56_vm0, %v44_v8 }
  0x2a   :  { %396 = vmatpush3.msra.mxu0 %v233_v12  ;;  %399 = vmatprep.mubr.msk.f32.mxu0 %vm56_vm0, %v43_v3 }
  0x2b   :  { %397 = vmatprep.subr.mxu0 %v232_v13 }
  0x2c   :  { %398 = vmatpush3.msra.mxu0 %v232_v13 }
  0x2d   :  { %400 = vmatmul.mubr.msk.f32.vlgmr.msra.gmra.mxu0 %vm56_vm0, %v44_v8 }
  0xe5   :  { %v379_v15 = vpop.f32.mrf.mxu0 }
  0xe6   :  { %v135_v16 = vadd.f32 %v379_v15, %v340_v14 }
  0xe7   :  { %v129_v17 = vpop.f32.mrf.mxu0 }
  0xe8   :  { %139 = vst.msk [vmem:[#allocation7 + $0x8] sm:$0xff] %vm56_vm0, %v135_v16  ;;  %v130_v19 = vadd.f32 %v340_v14, %v129_v17 }
  0xe9   :  { %v390_v20 = vpop.f32.mrf.mxu1 }
  0xea   :  { %138 = vst.msk [vmem:[#allocation7] sm:$0xff] %vm56_vm0, %v130_v19  ;;  %v225_v21 = vadd.f32 %v390_v20, %v344_v18 }
  0xeb   :  { %v219_v22 = vpop.f32.mrf.mxu1 }
  0xec   :  { %230 = vst.msk [vmem:[#allocation7 + $0x18] sm:$0xff] %vm56_vm0, %v225_v21  ;;  %v220_v24 = vadd.f32 %v344_v18, %v219_v22 }
  0xed   :  { %v401_v25 = vpop.f32.mrf.mxu0 }
  0xee   :  { %229 = vst.msk [vmem:[#allocation7 + $0x10] sm:$0xff] %vm56_vm0, %v220_v24  ;;  %v316_v26 = vadd.f32 %v401_v25, %v348_v23 }
  0xef   :  { %v310_v27 = vpop.f32.mrf.mxu0 }
  0xf0   :  { %321 = vst.msk [vmem:[#allocation7 + $0x28] sm:$0xff] %vm56_vm0, %v316_v26  ;;  %v311_v28 = vadd.f32 %v348_v23, %v310_v27 }
  0xf2   :  { %320 = vst.msk [vmem:[#allocation7 + $0x20] sm:$0xff] %vm56_vm0, %v311_v28 }
  0xf3   :  { %458 = shalt.err (!%p455_p0)
}
  0xf4   :  { %333 = dma.vmem_to_hbm [thread:$0]  %s328_s29, 768, %s540_s3, [#allocation4], %s474_s15, %s474_s15, %s475_s16  }
  0xf5   :  { %471 = dma.done.wait [#allocation4], 768  }
  0xf6   :  { %472 = vsyncadd [#allocation4], 4294966528 }
  0xf7   :  { %337 = vsyncpa [#allocation3], 1 }
  0xf8   :  { %338 = vsyncpa [#allocation6], 1 }
  0xf9   :  { %339 = vsyncpa [#allocation4], 1 }

</bundles_post_ra>
